<compile_context>
chip_gen: v5e
topology: v5e:2x2
jax: 0.10.0
libtpu: 0.0.40
codegen_flags: <defaults>
</compile_context>

<pallas_src>
import math

import jax
import jax.numpy as jnp
from jax.experimental import pallas as pl
from jax.experimental.pallas import tpu as pltpu

_MIB = 1024 * 1024
_FUSED_VMEM_BUDGET = 24 * _MIB  # conservative across v5e/v6e/v7x


def _round_up(x, m):
    return ((x + m - 1) // m) * m


def _device_mxu_tile():
    """256 for v6e/v7x (2x256x256 MXU); 128 for v5e (4x128x128 MXU)."""
    try:
        kind = jax.devices()[0].device_kind.lower()
        if "v5 lite" in kind or "v5e" in kind or "v5lite" in kind:
            return 128
    except Exception:
        pass
    return 256


def _vmem_capacity_bytes():
    try:
        return int(pltpu.get_tpu_info().vmem_capacity_bytes)
    except Exception:
        return 64 * _MIB  # conservative (v7x); v5e/v6e have 128 MiB


def _vmem_limit(need_bytes):
    cap = min(int(0.85 * _vmem_capacity_bytes()), 100 * _MIB)
    return int(min(max(2 * need_bytes, 16 * _MIB), cap))


def _pick_block_b(B, max_block_b):
    # Multiple of 16 so bf16 LHS fully packs the [16,128] sublane layout.
    return min(_round_up(B, 16), max(16, _round_up(max_block_b, 16)))


# --------------------------------------------------------------------------
# Kernels
# --------------------------------------------------------------------------
def _fused_mlp_kernel(x_ref, w1_ref, b1_ref, w2_ref, b2_ref, o_ref):
    # Cast x -> bf16 in-kernel (VPU op, hidden under the MXU push) so the
    # wrapper does no extra HBM pass over the activations.
    x = x_ref[...].astype(jnp.bfloat16)
    h = jnp.dot(x, w1_ref[...], preferred_element_type=jnp.float32)
    h = jnp.maximum(h + b1_ref[...], 0.0)  # fp32 VPU epilogue (v5e-safe)
    y = jnp.dot(h.astype(jnp.bfloat16), w2_ref[...],
                preferred_element_type=jnp.float32)
    o_ref[...] = (y + b2_ref[...]).astype(o_ref.dtype)


def _tiled_mlp_kernel(x_ref, w1_ref, b1_ref, w2_ref, b2_ref, o_ref,
                      h_scr, acc_scr):
    k = pl.program_id(2)

    @pl.when(k == 0)
    def _():
        acc_scr[...] = jnp.zeros_like(acc_scr)

    # fc1 for this hidden block; stage the activation through a bf16 VMEM
    # scratch (keeps the intermediate out of the vreg file / spill path).
    h = jnp.dot(x_ref[...].astype(jnp.bfloat16), w1_ref[...],
                preferred_element_type=jnp.float32)
    h_scr[...] = jnp.maximum(h + b1_ref[...], 0.0).astype(jnp.bfloat16)

    # fc2 partial product for this (hidden, out) tile, fp32 accumulation.
    acc_scr[...] += jnp.dot(h_scr[...], w2_ref[...],
                            preferred_element_type=jnp.float32)

    @pl.when(k == pl.num_programs(2) - 1)
    def _():
        o_ref[...] = (acc_scr[...] + b2_ref[...]).astype(o_ref.dtype)


# --------------------------------------------------------------------------
# One-time parameter preparation (hoisted out of the per-call forward)
# --------------------------------------------------------------------------
def prepare_params(w1, b1, w2, b2, *, max_block_b=256, mode="auto"):
    """Cast weights to bf16 once (and pad to tile multiples in the tiled path).

    w1: [input_size, hidden_size], b1: [hidden_size]
    w2: [hidden_size, output_size], b2: [output_size]
    Returns (params, plan) for chatbot_model_forward.
    """
    In, H = w1.shape
    H2, Out = w2.shape
    assert H2 == H and b1.shape == (H,) and b2.shape == (Out,)

    mxu = _device_mxu_tile()
    bb = max(16, max_block_b)

    # Resident-VMEM estimate for the fully fused path (double-buffered specs).
    fused_need = (2 * (In * H + H * Out) * 2      # bf16 weights, 2 buffers
                  + 2 * (H + Out) * 4             # fp32 biases
                  + 2 * bb * In * 4               # fp32 x tiles
                  + 2 * bb * Out * 4              # fp32 out tiles
                  + bb * H * (4 + 2))             # fp32 h + bf16 repack

    use_fused = (mode == "fused") or (mode == "auto"
                                      and fused_need <= _FUSED_VMEM_BUDGET)

    if use_fused:
        params = (w1.astype(jnp.bfloat16),
                  b1.reshape(1, H).astype(jnp.float32),
                  w2.astype(jnp.bfloat16),
                  b2.reshape(1, Out).astype(jnp.float32))
        plan = dict(mode="fused", in_features=In, hidden=H, out_features=Out,
                    max_block_b=max_block_b, vmem_need=fused_need)
        return params, plan

    # Tiled path: tile hidden (contraction of fc2) and, when large, Out.
    # Zero padding to tile multiples is semantics-preserving (zero weight
    # columns/rows and zero biases contribute nothing).
    # TODO(synk): the input contraction dim (In) is kept whole; tile it too if
    # input_size ever gets large enough to pressure VMEM.
    block_h = mxu
    Hp = _round_up(H, block_h)
    if Out <= 2 * mxu:
        block_n, Outp = Out, Out        # full-extent Out block is legal
    else:
        block_n = mxu
        Outp = _round_up(Out, block_n)

    w1_p = jnp.pad(w1, ((0, 0), (0, Hp - H))).astype(jnp.bfloat16)
    w2_p = jnp.pad(w2, ((0, Hp - H), (0, Outp - Out))).astype(jnp.bfloat16)
    b1_p = jnp.pad(b1, (0, Hp - H)).reshape(1, Hp).astype(jnp.float32)
    b2_p = jnp.pad(b2, (0, Outp - Out)).reshape(1, Outp).astype(jnp.float32)

    tiled_need = (2 * bb * In * 4
                  + 2 * In * block_h * 2 + 2 * block_h * 4
                  + 2 * block_h * block_n * 2 + 2 * block_n * 4
                  + 2 * bb * block_n * 4
                  + bb * block_h * 2 + bb * block_n * 4)

    plan = dict(mode="tiled", in_features=In, hidden=H, out_features=Out,
                Hp=Hp, Outp=Outp, block_h=block_h, block_n=block_n,
                max_block_b=max_block_b, vmem_need=tiled_need)
    return (w1_p, b1_p, w2_p, b2_p), plan


# --------------------------------------------------------------------------
# Forward wrappers
# --------------------------------------------------------------------------
def _fused_forward(x, params, plan):
    w1_p, b1_p, w2_p, b2_p = params
    B, In = x.shape
    H, Out = plan["hidden"], plan["out_features"]

    block_b = _pick_block_b(B, plan["max_block_b"])
    nb = pl.cdiv(B, block_b)
    # Megacore sharding only pays once per-core work exceeds the weight DMA.
    sem = "parallel" if B >= 256 else "arbitrary"

    cost = pl.CostEstimate(
        flops=2 * B * (In * H + H * Out),
        transcendentals=0,
        bytes_accessed=(B * In * 4 + (In * H + H * Out) * 2
                        + (H + Out) * 4 + B * Out * 4),
    )
    compiler_params = pltpu.CompilerParams(
        dimension_semantics=(sem,),
        vmem_limit_bytes=_vmem_limit(plan["vmem_need"]),
    )

    return pl.pallas_call(
        _fused_mlp_kernel,
        out_shape=jax.ShapeDtypeStruct((B, Out), jnp.float32),
        grid_spec=pltpu.PrefetchScalarGridSpec(
            num_scalar_prefetch=0,
            grid=(nb,),
            in_specs=[
                pl.BlockSpec((block_b, In), lambda i: (i, 0)),   # x tile
                pl.BlockSpec((In, H), lambda i: (0, 0)),         # w1 (resident)
                pl.BlockSpec((1, H), lambda i: (0, 0)),          # b1
                pl.BlockSpec((H, Out), lambda i: (0, 0)),        # w2 (resident)
                pl.BlockSpec((1, Out), lambda i: (0, 0)),        # b2
            ],
            out_specs=pl.BlockSpec((block_b, Out), lambda i: (i, 0)),
        ),
        compiler_params=compiler_params,
        cost_estimate=cost,
    )(x, w1_p, b1_p, w2_p, b2_p)


def _tiled_forward(x, params, plan):
    w1_p, b1_p, w2_p, b2_p = params
    B, In = x.shape
    Out = plan["out_features"]
    Hp, Outp = plan["Hp"], plan["Outp"]
    block_h, block_n = plan["block_h"], plan["block_n"]

    block_b = _pick_block_b(B, plan["max_block_b"])
    nb = pl.cdiv(B, block_b)
    no = Outp // block_n
    nh = Hp // block_h

    cost = pl.CostEstimate(
        flops=2 * B * (In * Hp * no + Hp * Outp),
        transcendentals=0,
        bytes_accessed=(B * In * 4 + (In * Hp * no + Hp * Outp) * 2
                        + (Hp + Outp) * 4 + B * Outp * 4),
    )
    compiler_params = pltpu.CompilerParams(
        dimension_semantics=("parallel", "parallel", "arbitrary"),
        vmem_limit_bytes=_vmem_limit(plan["vmem_need"]),
    )

    out_p = pl.pallas_call(
        _tiled_mlp_kernel,
        out_shape=jax.ShapeDtypeStruct((B, Outp), jnp.float32),
        grid_spec=pltpu.PrefetchScalarGridSpec(
            num_scalar_prefetch=0,
            grid=(nb, no, nh),
            in_specs=[
                pl.BlockSpec((block_b, In), lambda i, j, k: (i, 0)),     # x
                pl.BlockSpec((In, block_h), lambda i, j, k: (0, k)),     # w1
                pl.BlockSpec((1, block_h), lambda i, j, k: (0, k)),      # b1
                pl.BlockSpec((block_h, block_n), lambda i, j, k: (k, j)),  # w2
                pl.BlockSpec((1, block_n), lambda i, j, k: (0, j)),      # b2
            ],
            out_specs=pl.BlockSpec((block_b, block_n), lambda i, j, k: (i, j)),
            scratch_shapes=[
                pltpu.VMEM((block_b, block_h), jnp.bfloat16),   # staged fc1 out
                pltpu.VMEM((block_b, block_n), jnp.float32),    # fc2 accumulator
            ],
        ),
        compiler_params=compiler_params,
        cost_estimate=cost,
    )(x, w1_p, b1_p, w2_p, b2_p)

    return out_p if Outp == Out else out_p[:, :Out]


def chatbot_model_forward(x, params, plan):
    """Fused fc1 -> ReLU -> fc2. x: [B, input_size] fp32 -> [B, output_size] fp32."""
    if plan["mode"] == "fused":
        return _fused_forward(x, params, plan)
    return _tiled_forward(x, params, plan)


def init_params(key, input_size, hidden_size, output_size):
    """Deterministic init mimicking nn.Linear's U(-1/sqrt(fan_in), 1/sqrt(fan_in))."""
    k1, k2, k3, k4 = jax.random.split(key, 4)
    bound1 = 1.0 / math.sqrt(input_size)
    bound2 = 1.0 / math.sqrt(hidden_size)
    w1 = jax.random.uniform(k1, (input_size, hidden_size), jnp.float32,
                            -bound1, bound1)
    b1 = jax.random.uniform(k2, (hidden_size,), jnp.float32, -bound1, bound1)
    w2 = jax.random.uniform(k3, (hidden_size, output_size), jnp.float32,
                            -bound2, bound2)
    b2 = jax.random.uniform(k4, (output_size,), jnp.float32, -bound2, bound2)
    return w1, b1, w2, b2


if __name__ == "__main__":
    key = jax.random.PRNGKey(0)
    kx, kp, kx2, kp2 = jax.random.split(key, 4)

    # --- Small demo shapes: fused, single grid step, no feature padding ---
    batch, input_size, hidden_size, output_size = 16, 32, 64, 16
    x = jax.random.normal(kx, (batch, input_size), jnp.float32)
    w1, b1, w2, b2 = init_params(kp, input_size, hidden_size, output_size)

    params, plan = prepare_params(w1, b1, w2, b2)
    assert plan["mode"] == "fused"
    out = jax.block_until_ready(chatbot_model_forward(x, params, plan))
    assert out.shape == (batch, output_size)
    assert out.dtype == jnp.float32

    # Reference with matching numerics (bf16 operands, fp32 accumulation).
    xb, w1b, w2b = (a.astype(jnp.bfloat16) for a in (x, w1, w2))
    h_ref = jnp.maximum(
        jnp.dot(xb, w1b, preferred_element_type=jnp.float32) + b1, 0.0)
    ref_bf16 = jnp.dot(h_ref.astype(jnp.bfloat16), w2b,
                       preferred_element_type=jnp.float32) + b2
    assert jnp.allclose(out, ref_bf16, atol=2e-3, rtol=2e-3), \
        float(jnp.max(jnp.abs(out - ref_bf16)))

    # Loose check against the exact fp32 math of the original nn.Module.
    ref_f32 = jnp.maximum(x @ w1 + b1, 0.0) @ w2 + b2
    assert jnp.allclose(out, ref_f32, atol=5e-2, rtol=5e-2)

    # --- Exercise the tiled (hidden-dim accumulation) path as well ---
    batch2, in2, hid2, out2 = 32, 128, 512, 256
    x2 = jax.random.normal(kx2, (batch2, in2), jnp.float32)
    W1, B1, W2, B2 = init_params(kp2, in2, hid2, out2)
    params2, plan2 = prepare_params(W1, B1, W2, B2, mode="tiled")
    assert plan2["mode"] == "tiled"
    out_t = jax.block_until_ready(chatbot_model_forward(x2, params2, plan2))
    assert out_t.shape == (batch2, out2)

    x2b, W1b, W2b = (a.astype(jnp.bfloat16) for a in (x2, W1, W2))
    h2_ref = jnp.maximum(
        jnp.dot(x2b, W1b, preferred_element_type=jnp.float32) + B1, 0.0)
    ref2_bf16 = jnp.dot(h2_ref.astype(jnp.bfloat16), W2b,
                        preferred_element_type=jnp.float32) + B2
    assert jnp.allclose(out_t, ref2_bf16, atol=2e-3, rtol=2e-3), \
        float(jnp.max(jnp.abs(out_t - ref2_bf16)))
    ref2_f32 = jnp.maximum(x2 @ W1 + B1, 0.0) @ W2 + B2
    assert jnp.allclose(out_t, ref2_f32, atol=1e-1, rtol=1e-1)

    print("KERNEL_OK")
</pallas_src>

<mosaic_0001>
module attributes {stable_mosaic.version = 11 : i64} {
  func.func @_fused_mlp_kernel(%arg0: i32, %arg1: memref<16x32xf32, #tpu.memory_space<vmem>>, %arg2: memref<32x64xbf16, #tpu.memory_space<vmem>>, %arg3: memref<1x64xf32, #tpu.memory_space<vmem>>, %arg4: memref<64x16xbf16, #tpu.memory_space<vmem>>, %arg5: memref<1x16xf32, #tpu.memory_space<vmem>>, %arg6: memref<16x16xf32, #tpu.memory_space<vmem>>) attributes {dimension_semantics = [#tpu.dimension_semantics<arbitrary>], iteration_bounds = array<i64: 1>, scalar_prefetch = 0 : i64, scratch_operands = 0 : i64, tpu.core_type = #tpu.core_type<tc>, window_params = [{transform_indices = @transform_0, window_bounds = array<i64: 16, 32>}, {pipeline_mode = #tpu.pipeline_mode<synchronous>, transform_indices = @transform_1, window_bounds = array<i64: 32, 64>}, {pipeline_mode = #tpu.pipeline_mode<synchronous>, transform_indices = @transform_2, window_bounds = array<i64: 1, 64>}, {pipeline_mode = #tpu.pipeline_mode<synchronous>, transform_indices = @transform_3, window_bounds = array<i64: 64, 16>}, {pipeline_mode = #tpu.pipeline_mode<synchronous>, transform_indices = @transform_4, window_bounds = array<i64: 1, 16>}, {transform_indices = @transform_5, window_bounds = array<i64: 16, 16>}]} {
    %c0 = arith.constant 0 : index
    %c0_0 = arith.constant 0 : index
    %0 = vector.load %arg1[%c0, %c0_0] : memref<16x32xf32, #tpu.memory_space<vmem>>, vector<16x32xf32>
    %1 = arith.truncf %0 : vector<16x32xf32> to vector<16x32xbf16>
    %c0_1 = arith.constant 0 : index
    %c0_2 = arith.constant 0 : index
    %2 = vector.load %arg2[%c0_1, %c0_2] : memref<32x64xbf16, #tpu.memory_space<vmem>>, vector<32x64xbf16>
    %cst = arith.constant dense<0.000000e+00> : vector<16x64xf32>
    %3 = tpu.matmul %1, %2, %cst {dimension_numbers = #tpu.dot_dimension_numbers<[1], [0], [0], [1], [0, 0, 1, 1], [], []>} : vector<16x32xbf16>, vector<32x64xbf16>, vector<16x64xf32> -> vector<16x64xf32>
    %c0_3 = arith.constant 0 : index
    %c0_4 = arith.constant 0 : index
    %4 = vector.load %arg3[%c0_3, %c0_4] : memref<1x64xf32, #tpu.memory_space<vmem>>, vector<1x64xf32>
    %5 = vector.broadcast %4 : vector<1x64xf32> to vector<16x64xf32>
    %6 = arith.addf %3, %5 : vector<16x64xf32>
    %cst_5 = arith.constant 0.000000e+00 : f32
    %7 = vector.broadcast %cst_5 : f32 to vector<16x64xf32>
    %8 = arith.maximumf %6, %7 : vector<16x64xf32>
    %9 = arith.truncf %8 : vector<16x64xf32> to vector<16x64xbf16>
    %c0_6 = arith.constant 0 : index
    %c0_7 = arith.constant 0 : index
    %10 = vector.load %arg4[%c0_6, %c0_7] : memref<64x16xbf16, #tpu.memory_space<vmem>>, vector<64x16xbf16>
    %cst_8 = arith.constant dense<0.000000e+00> : vector<16x16xf32>
    %11 = tpu.matmul %9, %10, %cst_8 {dimension_numbers = #tpu.dot_dimension_numbers<[1], [0], [0], [1], [0, 0, 1, 1], [], []>} : vector<16x64xbf16>, vector<64x16xbf16>, vector<16x16xf32> -> vector<16x16xf32>
    %c0_9 = arith.constant 0 : index
    %c0_10 = arith.constant 0 : index
    %12 = vector.load %arg5[%c0_9, %c0_10] : memref<1x16xf32, #tpu.memory_space<vmem>>, vector<1x16xf32>
    %13 = vector.broadcast %12 : vector<1x16xf32> to vector<16x16xf32>
    %14 = arith.addf %11, %13 : vector<16x16xf32>
    %c0_11 = arith.constant 0 : index
    %c0_12 = arith.constant 0 : index
    %15 = vector.load %arg6[%c0_11, %c0_12] : memref<16x16xf32, #tpu.memory_space<vmem>>, vector<16x16xf32>
    tpu.vector_store %arg6[%c0_11, %c0_12], %14 {strides = array<i32>} : memref<16x16xf32, #tpu.memory_space<vmem>>, vector<16x16xf32>,
    return
  }
  func.func @transform_0(%arg0: i32) -> (i32, i32) {
    %c0_i32 = arith.constant 0 : i32
    %c0_i32_0 = arith.constant 0 : i32
    return %arg0, %c0_i32 : i32, i32
  }
  func.func @transform_1(%arg0: i32) -> (i32, i32) {
    %c0_i32 = arith.constant 0 : i32
    %c0_i32_0 = arith.constant 0 : i32
    %c0_i32_1 = arith.constant 0 : i32
    return %c0_i32, %c0_i32_0 : i32, i32
  }
  func.func @transform_2(%arg0: i32) -> (i32, i32) {
    %c0_i32 = arith.constant 0 : i32
    %c0_i32_0 = arith.constant 0 : i32
    %c0_i32_1 = arith.constant 0 : i32
    return %c0_i32, %c0_i32_0 : i32, i32
  }
  func.func @transform_3(%arg0: i32) -> (i32, i32) {
    %c0_i32 = arith.constant 0 : i32
    %c0_i32_0 = arith.constant 0 : i32
    %c0_i32_1 = arith.constant 0 : i32
    return %c0_i32, %c0_i32_0 : i32, i32
  }
  func.func @transform_4(%arg0: i32) -> (i32, i32) {
    %c0_i32 = arith.constant 0 : i32
    %c0_i32_0 = arith.constant 0 : i32
    %c0_i32_1 = arith.constant 0 : i32
    return %c0_i32, %c0_i32_0 : i32, i32
  }
  func.func @transform_5(%arg0: i32) -> (i32, i32) {
    %c0_i32 = arith.constant 0 : i32
    %c0_i32_0 = arith.constant 0 : i32
    return %arg0, %c0_i32 : i32, i32
  }
}

</mosaic_0001>

<bundles_post_ra>
// kernel: tpu_custom_call.1
= control target key start
LH: loop header
LB: loop body
LE: loop exit
PB: predicated region body
PF: predicated region fallthrough
CT: control target
= control target key end

     0   :  { %s270_s0 = inlined_call_operand.vmem [shape: f32[16,32], index: 0, kind: input, shape index: {}]   ;;  %s271_s1 = inlined_call_operand.vmem [shape: bf16[32,64], index: 1, kind: input, shape index: {}]   ;;  %s272_s2 = inlined_call_operand.vmem [shape: f32[1,64], index: 2, kind: input, shape index: {}]   ;;  %s273_s3 = inlined_call_operand.vmem [shape: bf16[64,16], index: 3, kind: input, shape index: {}]   ;;  %s274_s4 = inlined_call_operand.vmem [shape: f32[1,16], index: 4, kind: input, shape index: {}]   ;;  %s275_s5 = inlined_call_operand.hbm [shape: f32[16,16], index: 5, kind: output, shape index: {}]  }
   0x1   :  { %v168_v0 = vld [vmem:[%s271_s1 + $0x8] sm:$0xff]  ;;  %v167_v1 = vld [vmem:[%s271_s1] sm:$0xff] }
   0x2   :  { %v22_v2 = vld [vmem:[%s270_s0] sm:$0xff]  ;;  %55 = vmatpush.bf16.msra.mxu0 %v168_v0  ;;  %v23_v3 = vld [vmem:[%s270_s0 + $0x8] sm:$0xff] }
   0x3   :  { %10 = vsyncpa [#allocation3], 0  ;;  %v24_v4 = vpack.c.bf16 %v23_v3, %v22_v2  ;;  %vm45_vm0 = vcmask 261120   ;;  %v172_v5 = vld [vmem:[%s273_s3 + $0x18] sm:$0xff]  ;;  %v171_v6 = vld [vmem:[%s273_s3 + $0x10] sm:$0xff]  ;;  %vm102_vm1 = vcmask 523264  }
   0x4   :  { %110 = vmatpush.bf16.msra.mxu1 %v172_v5  ;;  %v170_v7 = vld [vmem:[%s273_s3 + $0x8] sm:$0xff]  ;;  %v169_v8 = vld [vmem:[%s273_s3] sm:$0xff]  ;;  %vm120_vm2 = vcmask 130048   ;;  %s204_s3 = smov [#allocation2]   ;;  %s129_s13 = sshll.u32 %s275_s5, 4  ;;  %s130_s13 = int_to_ptr.hbm [resolvable:$true] %s129_s13 }
   0x5   :  { %v176_v10 = vld [vmem:[%s272_s2] ss:$0 sm:$0xff]  ;;  %s127_s11 = sshll.u32 %s204_s3, 4  ;;  %s205_s14 = smov 128   ;;  %s128_s11 = int_to_ptr.vmem [resolvable:$true] %s127_s11 }
   0x6   :  { %56 = vmatpush.bf16.msra.mxu0 %v167_v1  ;;  %v177_v17 = vld [vmem:[%s274_s4] ss:$0 sm:$0xff]  ;;  %s206_s15 = smov 8  }
   0x8   :  { %111 = vmatpush.bf16.msra.mxu1 %v171_v6 }
   0x9   :  { %149 = vmatmul.msk.bf16.vlgmr.msra.gmra.mxu0 %vm45_vm0, %v24_v4 }
   0xc   :  { %112 = vmatpush.bf16.msra.mxu1 %v170_v7 }
  0x10   :  { %113 = vmatpush.bf16.msra.mxu1 %v169_v8 }
  0x86   :  { %v58_v9 = vpop.f32.mrf.mxu0 }
  0x87   :  { %v59_v11 = vadd.f32 %v176_v10, %v58_v9 }
  0x89   :  { %v63_v14 = vmax.f32 %v59_v11, 0.0 }
  0x8e   :  { %v60_v12 = vpop.f32.mrf.mxu0 }
  0x8f   :  { %v61_v13 = vadd.f32 %v176_v10, %v60_v12 }
  0x91   :  { %v64_v15 = vmax.f32 %v61_v13, 0.0 }
  0x93   :  { %v65_v16 = vpack.c.bf16 %v64_v15, %v63_v14 }
  0x95   :  { %166 = vmatmul.msk.bf16.vlgmr.msra.gmra.mxu1 %vm102_vm1, %v65_v16 }
 0x112   :  { %v115_v18 = vpop.f32.mrf.mxu1 }
 0x113   :  { %v116_v19 = vadd.f32 %v177_v17, %v115_v18 }
 0x115   :  { %121 = vst.msk [vmem:[#allocation2] sm:$0xff] %vm120_vm2, %v116_v19 }
 0x11a   :  { %v117_v20 = vpop.f32.mrf.mxu1 }
 0x11b   :  { %v118_v21 = vadd.f32 %v177_v17, %v117_v20 }
 0x11d   :  { %122 = vst.msk [vmem:[#allocation2 + $0x8] sm:$0xff] %vm120_vm2, %v118_v21 }
 0x11e   :  { %135 = dma.vmem_to_hbm [thread:$0]  %s128_s11, 256, %s130_s13, [#allocation3], %s205_s14, %s205_s14, %s206_s15  }
 0x11f   :  { %202 = dma.done.wait [#allocation3], 256  }
 0x120   :  { %203 = vsyncadd [#allocation3], 4294967040 }
 0x121   :  { %140 = vsyncpa [#allocation3], 1 }

</bundles_post_ra>
